<compile_context>
chip_gen: v5e
topology: v5e:2x2
jax: 0.10.0
libtpu: 0.0.40
codegen_flags: <defaults>
</compile_context>

<pallas_src>
import math
import jax
import jax.numpy as jnp
from jax import lax
from jax.experimental import pallas as pl
from jax.experimental.pallas import tpu as pltpu

_EPS = 1e-12  # matches torch.nn.functional.normalize default


def _round_up(v, m):
    return (v + m - 1) // m * m


def _normalize_rows_kernel(w_ref, o_ref):
    """Row-wise L2 normalization of one class tile of W."""
    w = w_ref[...].astype(jnp.float32)
    sumsq = jnp.sum(w * w, axis=-1, keepdims=True)
    # rsqrt(max(sumsq, eps^2)) == 1 / max(||w||, eps)  (sqrt is monotone)
    inv = lax.rsqrt(jnp.maximum(sumsq, _EPS * _EPS))
    o_ref[...] = (w * inv).astype(o_ref.dtype)


def _cosine_matmul_kernel(sigma_ref, x_ref, wn_ref, o_ref):
    """One (TM, TN) tile of logits: scale x rows by sigma/||x||, MXU matmul."""
    x = x_ref[...].astype(jnp.float32)                       # (TM, F)
    sumsq = jnp.sum(x * x, axis=-1, keepdims=True)           # f32 reduce
    scale = sigma_ref[0] * lax.rsqrt(jnp.maximum(sumsq, _EPS * _EPS))
    # Cast back to the input dtype so the MXU runs at native (e.g. bf16) rate.
    x_scaled = (x * scale).astype(x_ref.dtype)               # (TM, F)
    # Contract last-vs-last: no explicit transpose of the W tile.
    out = lax.dot_general(
        x_scaled, wn_ref[...],
        dimension_numbers=(((1,), (1,)), ((), ())),
        preferred_element_type=jnp.float32)                  # (TM, TN)
    o_ref[...] = out.astype(o_ref.dtype)


def cosine_classifier(x, weight, sigma=None, *, tm=256, tn=256):
    """x: (B, F), weight: (C, F), sigma: scalar array or None -> (B, C)."""
    B, F = x.shape
    C, F2 = weight.shape
    assert F == F2

    # Tile sizes: (8,128)-aligned, capped at 256 (keeps MXU full on v6e/v7x,
    # 128-multiples for v5e, and comfortably inside v7x's smaller VMEM).
    F_pad = _round_up(F, 128)
    TM = min(tm, _round_up(B, 8))
    TN = min(tn, _round_up(C, 128))          # lane-dense output tiles
    B_pad = _round_up(B, TM)
    C_pad = _round_up(C, TN)

    x_p = x if (B_pad == B and F_pad == F) else jnp.pad(
        x, ((0, B_pad - B), (0, F_pad - F)))
    w_p = weight if (C_pad == C and F_pad == F) else jnp.pad(
        weight, ((0, C_pad - C), (0, F_pad - F)))

    if sigma is None:
        sig = jnp.ones((1,), dtype=jnp.float32)
    else:
        sig = jnp.asarray(sigma, dtype=jnp.float32).reshape((1,))

    # --- prologue: normalize W rows once, tiled over classes -----------------
    w_norm = pl.pallas_call(
        _normalize_rows_kernel,
        out_shape=jax.ShapeDtypeStruct((C_pad, F_pad), weight.dtype),
        grid_spec=pltpu.PrefetchScalarGridSpec(
            num_scalar_prefetch=0,
            grid=(C_pad // TN,),
            in_specs=[pl.BlockSpec((TN, F_pad), lambda i: (i, 0))],
            out_specs=pl.BlockSpec((TN, F_pad), lambda i: (i, 0)),
        ),
        compiler_params=pltpu.CompilerParams(
            dimension_semantics=("parallel",)),
    )(w_p)

    # --- main: tiled cosine logits over (batch, classes) ---------------------
    # TODO(synk): if F ever needs tiling along the reduction axis, accumulate
    # sum-of-squares and partial dots over K tiles and normalize in a
    # pl.when(k == last) finalize step instead of per-K-tile normalization.
    out_p = pl.pallas_call(
        _cosine_matmul_kernel,
        out_shape=jax.ShapeDtypeStruct((B_pad, C_pad), x.dtype),
        grid_spec=pltpu.PrefetchScalarGridSpec(
            num_scalar_prefetch=0,
            grid=(B_pad // TM, C_pad // TN),
            in_specs=[
                pl.BlockSpec(memory_space=pltpu.SMEM),            # sigma scalar
                pl.BlockSpec((TM, F_pad), lambda i, j: (i, 0)),   # x batch tile
                pl.BlockSpec((TN, F_pad), lambda i, j: (j, 0)),   # normalized W tile
            ],
            out_specs=pl.BlockSpec((TM, TN), lambda i, j: (i, j)),
        ),
        compiler_params=pltpu.CompilerParams(
            dimension_semantics=("parallel", "parallel")),
    )(sig, x_p, w_norm)

    return out_p[:B, :C]


if __name__ == "__main__":
    # Small shapes consistent with the module: in_features=32, n_classes=16, batch=8.
    B, F, C = 8, 32, 16
    key = jax.random.PRNGKey(0)
    kx, kw = jax.random.split(key)

    # Deterministic init mirroring reset_parameters(): U(-stdv, stdv), sigma=1.
    stdv = 1.0 / math.sqrt(F)
    x = jax.random.normal(kx, (B, F), dtype=jnp.float32)
    weight = jax.random.uniform(kw, (C, F), dtype=jnp.float32,
                                minval=-stdv, maxval=stdv)
    sigma = jnp.ones((1,), dtype=jnp.float32)

    out = cosine_classifier(x, weight, sigma)
    out = jax.block_until_ready(out)

    # Reference check in plain JAX (same semantics as the PyTorch forward).
    eps = 1e-12
    xn = x / jnp.maximum(jnp.linalg.norm(x, axis=1, keepdims=True), eps)
    wn = weight / jnp.maximum(jnp.linalg.norm(weight, axis=1, keepdims=True), eps)
    ref = sigma[0] * (xn @ wn.T)

    assert out.shape == (B, C)
    assert jnp.allclose(out, ref, atol=1e-4, rtol=1e-4), (
        f"max abs err {jnp.max(jnp.abs(out - ref))}")

    print("KERNEL_OK")
</pallas_src>

<mosaic_0001>
module attributes {stable_mosaic.version = 11 : i64} {
  func.func @_normalize_rows_kernel(%arg0: i32, %arg1: memref<128x128xf32, #tpu.memory_space<vmem>>, %arg2: memref<128x128xf32, #tpu.memory_space<vmem>>) attributes {dimension_semantics = [#tpu.dimension_semantics<parallel>], iteration_bounds = array<i64: 1>, scalar_prefetch = 0 : i64, scratch_operands = 0 : i64, tpu.core_type = #tpu.core_type<tc>, window_params = [{transform_indices = @transform_0, window_bounds = array<i64: 128, 128>}, {transform_indices = @transform_1, window_bounds = array<i64: 128, 128>}]} {
    %c0 = arith.constant 0 : index
    %c0_0 = arith.constant 0 : index
    %0 = vector.load %arg1[%c0, %c0_0] : memref<128x128xf32, #tpu.memory_space<vmem>>, vector<128x128xf32>
    %1 = arith.mulf %0, %0 : vector<128x128xf32>
    %cst = arith.constant dense<0.000000e+00> : vector<128xf32>
    %2 = vector.multi_reduction <add>, %1, %cst [1] : vector<128x128xf32> to vector<128xf32>
    %3 = vector.shape_cast %2 : vector<128xf32> to vector<128x1xf32>
    %cst_1 = arith.constant 1.000000e-24 : f32
    %4 = vector.broadcast %cst_1 : f32 to vector<128x1xf32>
    %5 = arith.maximumf %3, %4 : vector<128x1xf32>
    %6 = math.rsqrt %5 : vector<128x1xf32>
    %7 = vector.broadcast %6 : vector<128x1xf32> to vector<128x128xf32>
    %8 = arith.mulf %0, %7 : vector<128x128xf32>
    %c0_2 = arith.constant 0 : index
    %c0_3 = arith.constant 0 : index
    %9 = vector.load %arg2[%c0_2, %c0_3] : memref<128x128xf32, #tpu.memory_space<vmem>>, vector<128x128xf32>
    tpu.vector_store %arg2[%c0_2, %c0_3], %8 {strides = array<i32>} : memref<128x128xf32, #tpu.memory_space<vmem>>, vector<128x128xf32>,
    return
  }
  func.func @transform_0(%arg0: i32) -> (i32, i32) {
    %c0_i32 = arith.constant 0 : i32
    %c0_i32_0 = arith.constant 0 : i32
    return %arg0, %c0_i32 : i32, i32
  }
  func.func @transform_1(%arg0: i32) -> (i32, i32) {
    %c0_i32 = arith.constant 0 : i32
    %c0_i32_0 = arith.constant 0 : i32
    return %arg0, %c0_i32 : i32, i32
  }
}

</mosaic_0001>

<bundles_post_ra>
// kernel: tpu_custom_call.1
= control target key start
LH: loop header
LB: loop body
LE: loop exit
PB: predicated region body
PF: predicated region fallthrough
CT: control target
= control target key end

     0   :  { %6 = vsyncpa [#allocation3], 0  ;;  %s628_s0 = inlined_call_operand.hbm [shape: f32[128,128], index: 0, kind: input, shape index: {}]   ;;  %s629_s1 = inlined_call_operand.hbm [shape: f32[128,128], index: 1, kind: output, shape index: {}]  }
   0x1   :  { %7 = vsyncpa [#allocation4], 0  ;;  %s12_s8 = sshll.u32 %s628_s0, 4  ;;  %s404_s9 = smov [#allocation2]   ;;  %s13_s8 = int_to_ptr.hbm [resolvable:$true] %s12_s8 }
   0x2   :  { %s14_s10 = sshll.u32 %s404_s9, 4  ;;  %s405_s11 = smov 128   ;;  %s15_s10 = int_to_ptr.vmem [resolvable:$true] %s14_s10 }
   0x3   :  { %s406_s12 = smov 8  }
   0x4   :  { %20 = dma.hbm_to_vmem [thread:$0]  %s13_s8, 2048, %s15_s10, [#allocation3], %s405_s11, %s405_s11, %s406_s12  }
   0x5   :  { %400 = dma.done.wait [#allocation3], 2048  }
   0x6   :  { %401 = vsyncadd [#allocation3], 4294965248  ;;  %v424_v0 = vld [vmem:[#allocation2 + $0x20] sm:$0xff]  ;;  %v426_v1 = vld [vmem:[#allocation2 + $0x10] sm:$0xff]  ;;  %s407_s0 = smov [#allocation5]   ;;  %s303_s16 = sshll.u32 %s629_s1, 4  ;;  %s304_s16 = int_to_ptr.hbm [resolvable:$true] %s303_s16 }
   0x7   :  { %v428_v2 = vld [vmem:[#allocation2] sm:$0xff]  ;;  %v45_v3 = vmul.f32 %v424_v0, %v424_v0  ;;  %v43_v4 = vmul.f32 %v426_v1, %v426_v1  ;;  %v436_v6 = vld [vmem:[#allocation2 + $0x28] sm:$0xff]  ;;  %v438_v7 = vld [vmem:[#allocation2 + $0x18] sm:$0xff]  ;;  %s301_s13 = sshll.u32 %s407_s0, 4  ;;  %s302_s13 = int_to_ptr.vmem [resolvable:$true] %s301_s13 }
   0x8   :  { %v41_v5 = vmul.f32 %v428_v2, %v428_v2  ;;  %v440_v8 = vld [vmem:[#allocation2 + $0x8] sm:$0xff]  ;;  %v46_v9 = vmul.f32 %v436_v6, %v436_v6  ;;  %v44_v10 = vmul.f32 %v438_v7, %v438_v7  ;;  %v448_v12 = vld [vmem:[#allocation2 + $0x40] sm:$0xff]  ;;  %v450_v13 = vld [vmem:[#allocation2 + $0x38] sm:$0xff] }
   0x9   :  { %65 = vadd.xlane.f32.xlu2 %v45_v3  ;;  %61 = vadd.xlane.f32.xlu1 %v43_v4  ;;  %v42_v11 = vmul.f32 %v440_v8, %v440_v8  ;;  %v452_v14 = vld [vmem:[#allocation2 + $0x30] sm:$0xff]  ;;  %v49_v15 = vmul.f32 %v448_v12, %v448_v12  ;;  %v48_v16 = vmul.f32 %v450_v13, %v450_v13  ;;  %v460_v18 = vld [vmem:[#allocation2 + $0x58] sm:$0xff]  ;;  %v464_v20 = vld [vmem:[#allocation2 + $0x48] sm:$0xff] }
   0xa   :  { %57 = vadd.xlane.f32.xlu0 %v41_v5  ;;  %v47_v17 = vmul.f32 %v452_v14, %v452_v14  ;;  %v462_v19 = vld [vmem:[#allocation2 + $0x50] sm:$0xff]  ;;  %v52_v21 = vmul.f32 %v460_v18, %v460_v18  ;;  %v50_v23 = vmul.f32 %v464_v20, %v464_v20  ;;  %v474_v25 = vld [vmem:[#allocation2 + $0x68] sm:$0xff]  ;;  %v476_v26 = vld [vmem:[#allocation2 + $0x60] sm:$0xff] }
   0xb   :  { %v51_v22 = vmul.f32 %v462_v19, %v462_v19  ;;  %v472_v24 = vld [vmem:[#allocation2 + $0x70] sm:$0xff]  ;;  %v54_v28 = vmul.f32 %v474_v25, %v474_v25  ;;  %v53_v29 = vmul.f32 %v476_v26, %v476_v26  ;;  %v484_v30 = vld [vmem:[#allocation2 + $0x78] sm:$0xff] }
   0xc   :  { %v55_v27 = vmul.f32 %v472_v24, %v472_v24  ;;  %v56_v31 = vmul.f32 %v484_v30, %v484_v30 }
  0x11   :  { %67 = vadd.xlane.f32.xlu2 %v46_v9  ;;  %63 = vadd.xlane.f32.xlu1 %v44_v10 }
  0x12   :  { %59 = vadd.xlane.f32.xlu0 %v42_v11 }
  0x19   :  { %73 = vadd.xlane.f32.xlu2 %v49_v15  ;;  %71 = vadd.xlane.f32.xlu1 %v48_v16 }
  0x1a   :  { %69 = vadd.xlane.f32.xlu0 %v47_v17 }
  0x21   :  { %79 = vadd.xlane.f32.xlu2 %v52_v21  ;;  %77 = vadd.xlane.f32.xlu1 %v51_v22 }
  0x22   :  { %75 = vadd.xlane.f32.xlu0 %v50_v23 }
  0x29   :  { %85 = vadd.xlane.f32.xlu2 %v55_v27  ;;  %83 = vadd.xlane.f32.xlu1 %v54_v28 }
  0x2a   :  { %81 = vadd.xlane.f32.xlu0 %v53_v29 }
  0x32   :  { %87 = vadd.xlane.f32.xlu0 %v56_v31 }
  0x7c   :  { %v66_v32 = vpop.xlane.xlu2 %65  ;;  %v62_v33 = vpop.xlane.xlu1 %61 }
  0x7d   :  { %v93_v34 = vmax.f32 %v66_v32, 1e-24  ;;  %v91_v35 = vmax.f32 %v62_v33, 1e-24  ;;  %v58_v36 = vpop.xlane.xlu0 %57 }
  0x7e   :  { %v89_v37 = vmax.f32 %v58_v36, 1e-24 }
  0x7f   :  { %320 = vrsqrt.f32 %v93_v34  ;;  %vm151_vm0 = vweird.f32 %v93_v34  ;;  %vm131_vm2 = vweird.f32 %v91_v35 }
  0x80   :  { %322 = vrsqrt.f32 %v91_v35  ;;  %vm111_vm4 = vweird.f32 %v89_v37 }
  0x81   :  { %324 = vrsqrt.f32 %v89_v37 }
  0x84   :  { %v68_v38 = vpop.xlane.xlu2 %67  ;;  %v64_v39 = vpop.xlane.xlu1 %63 }
  0x85   :  { %v321_v40 = vpop.eup %320  ;;  %v488_v41 = vmax.f32 %v68_v38, 1e-24  ;;  %v490_v42 = vmax.f32 %v64_v39, 1e-24  ;;  %v60_v43 = vpop.xlane.xlu0 %59 }
  0x86   :  { %v323_v44 = vpop.eup %322  ;;  %v146_v45 = vmul.f32 %v321_v40, %v93_v34  ;;  %v492_v46 = vmax.f32 %v60_v43, 1e-24  ;;  %vm152_vm1 = vweird.f32 %v321_v40 }
  0x87   :  { %v325_v47 = vpop.eup %324  ;;  %v126_v48 = vmul.f32 %v323_v44, %v91_v35  ;;  %326 = vrsqrt.f32 %v488_v41  ;;  %vm132_vm3 = vweird.f32 %v323_v44  ;;  %vm153_vm6 = vmor %vm151_vm0, %vm152_vm1  ;;  %vm161_vm9 = vweird.f32 %v488_v41 }
  0x88   :  { %v147_v49 = vmul.f32 %v321_v40, %v146_v45  ;;  %v106_v50 = vmul.f32 %v325_v47, %v89_v37  ;;  %328 = vrsqrt.f32 %v490_v42  ;;  %vm112_vm5 = vweird.f32 %v325_v47  ;;  %vm133_vm7 = vmor %vm131_vm2, %vm132_vm3 }
  0x89   :  { %v127_v51 = vmul.f32 %v323_v44, %v126_v48  ;;  %330 = vrsqrt.f32 %v492_v46  ;;  %vm113_vm8 = vmor %vm111_vm4, %vm112_vm5  ;;  %vm141_vm10 = vweird.f32 %v490_v42  ;;  %vm121_vm15 = vweird.f32 %v492_v46 }
  0x8a   :  { %v148_v52 = vmul.f32 0.5, %v147_v49  ;;  %v107_v53 = vmul.f32 %v325_v47, %v106_v50 }
  0x8b   :  { %v128_v54 = vmul.f32 0.5, %v127_v51 }
  0x8c   :  { %v149_v55 = vsub.f32 1.5, %v148_v52  ;;  %v108_v56 = vmul.f32 0.5, %v107_v53  ;;  %v74_v57 = vpop.xlane.xlu2 %73  ;;  %v72_v58 = vpop.xlane.xlu1 %71 }
  0x8d   :  { %v497_v59 = vpop.eup %326  ;;  %v129_v60 = vsub.f32 1.5, %v128_v54  ;;  %v499_v61 = vmax.f32 %v74_v57, 1e-24  ;;  %v70_v62 = vpop.xlane.xlu0 %69  ;;  %v512_v15 = vmax.f32 %v72_v58, 1e-24 }
  0x8e   :  { %v501_v63 = vpop.eup %328  ;;  %v150_v3 = vmul.f32 %v321_v40, %v149_v55  ;;  %v109_v4 = vsub.f32 1.5, %v108_v56  ;;  %v156_v5 = vmul.f32 %v497_v59, %v488_v41  ;;  %vm162_vm11 = vweird.f32 %v497_v59 }
  0x8f   :  { %v505_v9 = vpop.eup %330  ;;  %v130_v10 = vmul.f32 %v323_v44, %v129_v60  ;;  %v136_v11 = vmul.f32 %v501_v63, %v490_v42  ;;  %332 = vrsqrt.f32 %v499_v61  ;;  %v530_v37 = vmax.f32 %v70_v62, 1e-24  ;;  %vm163_vm14 = vmor %vm161_vm9, %vm162_vm11 }
  0x90   :  { %v154_v16 = vsel %vm153_vm6, %v321_v40, %v150_v3  ;;  %v110_v17 = vmul.f32 %v325_v47, %v109_v4  ;;  %v157_v21 = vmul.f32 %v497_v59, %v156_v5  ;;  %v116_v22 = vmul.f32 %v505_v9, %v492_v46 }
  0x91   :  { %v269_v23 = vmul.f32 %v154_v16, %v424_v0  ;;  %v134_v27 = vsel %vm133_vm7, %v323_v44, %v130_v10  ;;  %v137_v28 = vmul.f32 %v501_v63, %v136_v11  ;;  %334 = vrsqrt.f32 %v512_v15 }
  0x92   :  { %v267_v29 = vmul.f32 %v134_v27, %v426_v1  ;;  %v114_v31 = vsel %vm113_vm8, %v325_v47, %v110_v17  ;;  %v158_v32 = vmul.f32 0.5, %v157_v21  ;;  %v117_v33 = vmul.f32 %v505_v9, %v116_v22 }
  0x93   :  { %285 = vst [vmem:[#allocation5 + $0x20] sm:$0xff] %v269_v23  ;;  %v265_v34 = vmul.f32 %v114_v31, %v428_v2  ;;  %v138_v35 = vmul.f32 0.5, %v137_v28  ;;  %vm142_vm12 = vweird.f32 %v501_v63  ;;  %vm122_vm13 = vweird.f32 %v505_v9 }
  0x94   :  { %283 = vst [vmem:[#allocation5 + $0x10] sm:$0xff] %v267_v29  ;;  %v159_v0 = vsub.f32 1.5, %v158_v32  ;;  %v118_v36 = vmul.f32 0.5, %v117_v33  ;;  %v80_v1 = vpop.xlane.xlu2 %79  ;;  %v78_v38 = vpop.xlane.xlu1 %77  ;;  %336 = vrsqrt.f32 %v530_v37  ;;  %vm143_vm0 = vmor %vm141_vm10, %vm142_vm12  ;;  %vm191_vm2 = vweird.f32 %v499_v61 }
  0x95   :  { %v333_v39 = vpop.eup %332  ;;  %281 = vst [vmem:[#allocation5] sm:$0xff] %v265_v34  ;;  %v139_v40 = vsub.f32 1.5, %v138_v35  ;;  %v533_v2 = vmax.f32 %v80_v1, 1e-24  ;;  %v535_v43 = vmax.f32 %v78_v38, 1e-24  ;;  %v76_v44 = vpop.xlane.xlu0 %75  ;;  %vm123_vm1 = vmor %vm121_vm15, %vm122_vm13  ;;  %vm181_vm4 = vweird.f32 %v512_v15 }
  0x96   :  { %v160_v45 = vmul.f32 %v497_v59, %v159_v0  ;;  %v119_v47 = vsub.f32 1.5, %v118_v36  ;;  %v186_v48 = vmul.f32 %v333_v39, %v499_v61  ;;  %v559_v58 = vmax.f32 %v76_v44, 1e-24 }
  0x97   :  { %v140_v49 = vmul.f32 %v501_v63, %v139_v40  ;;  %338 = vrsqrt.f32 %v533_v2  ;;  %v335_v53 = vpop.eup %334  ;;  %vm192_vm3 = vweird.f32 %v333_v39  ;;  %vm171_vm7 = vweird.f32 %v530_v37 }
  0x98   :  { %v164_v50 = vsel %vm163_vm14, %v497_v59, %v160_v45  ;;  %v120_v51 = vmul.f32 %v505_v9, %v119_v47  ;;  %v187_v52 = vmul.f32 %v333_v39, %v186_v48  ;;  %340 = vrsqrt.f32 %v535_v43  ;;  %vm193_vm5 = vmor %vm191_vm2, %vm192_vm3 }
  0x99   :  { %v270_v41 = vmul.f32 %v164_v50, %v436_v6  ;;  %v144_v54 = vsel %vm143_vm0, %v501_v63, %v140_v49  ;;  %v176_v42 = vmul.f32 %v335_v53, %v512_v15  ;;  %342 = vrsqrt.f32 %v559_v58 }
  0x9a   :  { %v268_v46 = vmul.f32 %v144_v54, %v438_v7  ;;  %v124_v55 = vsel %vm123_vm1, %v505_v9, %v120_v51  ;;  %v188_v56 = vmul.f32 0.5, %v187_v52  ;;  %v337_v63 = vpop.eup %336  ;;  %vm182_vm6 = vweird.f32 %v335_v53 }
  0x9b   :  { %286 = vst [vmem:[#allocation5 + $0x28] sm:$0xff] %v270_v41  ;;  %v266_v57 = vmul.f32 %v124_v55, %v440_v8  ;;  %v177_v6 = vmul.f32 %v335_v53, %v176_v42  ;;  %v166_v10 = vmul.f32 %v337_v63, %v530_v37  ;;  %vm221_vm8 = vweird.f32 %v533_v2  ;;  %vm183_vm10 = vmor %vm181_vm4, %vm182_vm6 }
  0x9c   :  { %284 = vst [vmem:[#allocation5 + $0x18] sm:$0xff] %v268_v46  ;;  %v189_v59 = vsub.f32 1.5, %v188_v56  ;;  %v86_v60 = vpop.xlane.xlu2 %85  ;;  %v84_v62 = vpop.xlane.xlu1 %83  ;;  %vm211_vm9 = vweird.f32 %v535_v43  ;;  %vm172_vm11 = vweird.f32 %v337_v63  ;;  %vm201_vm15 = vweird.f32 %v559_v58 }
  0x9d   :  { %282 = vst [vmem:[#allocation5 + $0x8] sm:$0xff] %v266_v57  ;;  %v563_v7 = vmax.f32 %v86_v60, 1e-24  ;;  %v565_v3 = vmax.f32 %v84_v62, 1e-24  ;;  %v82_v4 = vpop.xlane.xlu0 %81  ;;  %v339_v8 = vpop.eup %338  ;;  %v178_v9 = vmul.f32 0.5, %v177_v6  ;;  %v167_v22 = vmul.f32 %v337_v63, %v166_v10  ;;  %vm173_vm14 = vmor %vm171_vm7, %vm172_vm11 }
  0x9e   :  { %v190_v5 = vmul.f32 %v333_v39, %v189_v59  ;;  %v341_v11 = vpop.eup %340  ;;  %v216_v16 = vmul.f32 %v339_v8, %v533_v2  ;;  %vm222_vm12 = vweird.f32 %v339_v8 }
  0x9f   :  { %344 = vrsqrt.f32 %v563_v7  ;;  %v179_v21 = vsub.f32 1.5, %v178_v9  ;;  %v206_v23 = vmul.f32 %v341_v11, %v535_v43  ;;  %v168_v29 = vmul.f32 0.5, %v167_v22  ;;  %v343_v32 = vpop.eup %342  ;;  %vm223_vm0 = vmor %vm221_vm8, %vm222_vm12 }
  0xa0   :  { %v194_v17 = vsel %vm193_vm5, %v333_v39, %v190_v5  ;;  %v217_v28 = vmul.f32 %v339_v8, %v216_v16  ;;  %346 = vrsqrt.f32 %v565_v3  ;;  %v196_v36 = vmul.f32 %v343_v32, %v559_v58 }
  0xa1   :  { %v273_v27 = vmul.f32 %v194_v17, %v448_v12  ;;  %v180_v61 = vmul.f32 %v335_v53, %v179_v21  ;;  %v207_v31 = vmul.f32 %v341_v11, %v206_v23  ;;  %v583_v12 = vmax.f32 %v82_v4, 1e-24 }
  0xa2   :  { %v218_v33 = vmul.f32 0.5, %v217_v28  ;;  %v169_v35 = vsub.f32 1.5, %v168_v29  ;;  %vm212_vm13 = vweird.f32 %v341_v11  ;;  %v197_v45 = vmul.f32 %v343_v32, %v196_v36 }
  0xa3   :  { %289 = vst [vmem:[#allocation5 + $0x40] sm:$0xff] %v273_v27  ;;  %v184_v34 = vsel %vm183_vm10, %v335_v53, %v180_v61  ;;  %v208_v0 = vmul.f32 0.5, %v207_v31  ;;  %348 = vrsqrt.f32 %v583_v12  ;;  %vm213_vm1 = vmor %vm211_vm9, %vm212_vm13  ;;  %vm202_vm2 = vweird.f32 %v343_v32 }
  0xa4   :  { %v272_v38 = vmul.f32 %v184_v34, %v450_v13  ;;  %v219_v39 = vsub.f32 1.5, %v218_v33  ;;  %v170_v15 = vmul.f32 %v337_v63, %v169_v35  ;;  %v198_v52 = vmul.f32 0.5, %v197_v45  ;;  %vm203_vm5 = vmor %vm201_vm15, %vm202_vm2 }
  0xa5   :  { %v345_v1 = vpop.eup %344  ;;  %v88_v40 = vpop.xlane.xlu0 %87  ;;  %v209_v44 = vsub.f32 1.5, %v208_v0  ;;  %vm251_vm3 = vweird.f32 %v563_v7  ;;  %vm241_vm7 = vweird.f32 %v565_v3  ;;  %vm231_vm11 = vweird.f32 %v583_v12 }
  0xa6   :  { %v246_v47 = vmul.f32 %v345_v1, %v563_v7  ;;  %v347_v48 = vpop.eup %346  ;;  %288 = vst [vmem:[#allocation5 + $0x38] sm:$0xff] %v272_v38  ;;  %v220_v49 = vmul.f32 %v339_v8, %v219_v39  ;;  %v593_v13 = vmax.f32 %v88_v40, 1e-24  ;;  %v174_v50 = vsel %vm173_vm14, %v337_v63, %v170_v15 }
  0xa7   :  { %v210_v51 = vmul.f32 %v341_v11, %v209_v44  ;;  %v271_v41 = vmul.f32 %v174_v50, %v452_v14  ;;  %v236_v37 = vmul.f32 %v347_v48, %v565_v3  ;;  %v199_v56 = vsub.f32 1.5, %v198_v52 }
  0xa8   :  { %v247_v53 = vmul.f32 %v345_v1, %v246_v47  ;;  %v224_v54 = vsel %vm223_vm0, %v339_v8, %v220_v49  ;;  %350 = vrsqrt.f32 %v593_v13  ;;  %vm252_vm4 = vweird.f32 %v345_v1 }
  0xa9   :  { %v276_v46 = vmul.f32 %v224_v54, %v460_v18  ;;  %v214_v55 = vsel %vm213_vm1, %v341_v11, %v210_v51  ;;  %v349_v2 = vpop.eup %348  ;;  %287 = vst [vmem:[#allocation5 + $0x30] sm:$0xff] %v271_v41  ;;  %v237_v14 = vmul.f32 %v347_v48, %v236_v37  ;;  %v200_v43 = vmul.f32 %v343_v32, %v199_v56  ;;  %vm253_vm6 = vmor %vm251_vm3, %vm252_vm4 }
  0xaa   :  { %v248_v42 = vmul.f32 0.5, %v247_v53  ;;  %v275_v57 = vmul.f32 %v214_v55, %v462_v19  ;;  %v226_v6 = vmul.f32 %v349_v2, %v583_v12  ;;  %vm242_vm8 = vweird.f32 %v347_v48 }
  0xab   :  { %292 = vst [vmem:[#allocation5 + $0x58] sm:$0xff] %v276_v46  ;;  %v238_v18 = vmul.f32 0.5, %v237_v14  ;;  %v204_v60 = vsel %vm203_vm5, %v343_v32, %v200_v43  ;;  %vm243_vm9 = vmor %vm241_vm7, %vm242_vm8  ;;  %vm232_vm10 = vweird.f32 %v349_v2  ;;  %vm261_vm14 = vweird.f32 %v593_v13 }
  0xac   :  { %v249_v59 = vsub.f32 1.5, %v248_v42  ;;  %291 = vst [vmem:[#allocation5 + $0x50] sm:$0xff] %v275_v57  ;;  %v227_v19 = vmul.f32 %v349_v2, %v226_v6  ;;  %v274_v63 = vmul.f32 %v204_v60, %v464_v20  ;;  %vm233_vm12 = vmor %vm231_vm11, %vm232_vm10 }
  0xad   :  { %v239_v4 = vsub.f32 1.5, %v238_v18 }
  0xae   :  { %v250_v62 = vmul.f32 %v345_v1, %v249_v59  ;;  %v228_v5 = vmul.f32 0.5, %v227_v19  ;;  %v351_v9 = vpop.eup %350  ;;  %290 = vst [vmem:[#allocation5 + $0x48] sm:$0xff] %v274_v63 }
  0xaf   :  { %v240_v10 = vmul.f32 %v347_v48, %v239_v4  ;;  %v256_v16 = vmul.f32 %v351_v9, %v593_v13  ;;  %vm262_vm13 = vweird.f32 %v351_v9 }
  0xb0   :  { %v254_v8 = vsel %vm253_vm6, %v345_v1, %v250_v62  ;;  %v229_v11 = vsub.f32 1.5, %v228_v5  ;;  %vm263_vm15 = vmor %vm261_vm14, %vm262_vm13 }
  0xb1   :  { %v279_v58 = vmul.f32 %v254_v8, %v472_v24  ;;  %v244_v20 = vsel %vm243_vm9, %v347_v48, %v240_v10  ;;  %v257_v3 = vmul.f32 %v351_v9, %v256_v16 }
  0xb2   :  { %v278_v7 = vmul.f32 %v244_v20, %v474_v25  ;;  %v230_v17 = vmul.f32 %v349_v2, %v229_v11 }
  0xb3   :  { %295 = vst [vmem:[#allocation5 + $0x70] sm:$0xff] %v279_v58  ;;  %v258_v22 = vmul.f32 0.5, %v257_v3 }
  0xb4   :  { %294 = vst [vmem:[#allocation5 + $0x68] sm:$0xff] %v278_v7  ;;  %v234_v21 = vsel %vm233_vm12, %v349_v2, %v230_v17 }
  0xb5   :  { %v277_v24 = vmul.f32 %v234_v21, %v476_v26  ;;  %v259_v23 = vsub.f32 1.5, %v258_v22 }
  0xb7   :  { %293 = vst [vmem:[#allocation5 + $0x60] sm:$0xff] %v277_v24  ;;  %v260_v27 = vmul.f32 %v351_v9, %v259_v23 }
  0xb9   :  { %v264_v25 = vsel %vm263_vm15, %v351_v9, %v260_v27 }
  0xba   :  { %v280_v28 = vmul.f32 %v264_v25, %v484_v30 }
  0xbc   :  { %296 = vst [vmem:[#allocation5 + $0x78] sm:$0xff] %v280_v28 }
  0xbd   :  { %309 = dma.vmem_to_hbm [thread:$0]  %s302_s13, 2048, %s304_s16, [#allocation4], %s405_s11, %s405_s11, %s406_s12  }
  0xbe   :  { %402 = dma.done.wait [#allocation4], 2048  }
  0xbf   :  { %403 = vsyncadd [#allocation4], 4294965248 }
  0xc0   :  { %314 = vsyncpa [#allocation3], 1 }
  0xc1   :  { %315 = vsyncpa [#allocation4], 1 }

</bundles_post_ra>
